<compile_context>
chip_gen: v6e
topology: v6e:2x2x1
jax: 0.10.0
libtpu: 0.0.40
codegen_flags: <defaults>
</compile_context>

<pallas_src>
import jax
import jax.numpy as jnp
from jax import lax
from jax.experimental import pallas as pl
from jax.experimental.pallas import tpu as pltpu

# TODO(synk): `f` is an arbitrary user callable in the original module; it is
# instantiated here as a fixed contrast/brightness transform (no generic
# translation of an opaque Python callable is possible).
_CONTRAST = 1.2
_BRIGHTNESS = 0.1

_TARGET_BLOCK_BYTES = 4 * 1024 * 1024   # ~4 MiB per block -> 16 MiB double-buffered
_VMEM_LIMIT_BYTES = 32 * 1024 * 1024    # safe on v5e / v6e / v7x scoped VMEM
_LANE_CHOICES = (512, 256, 128)         # lane-dense last dim, multiple of 128


def _transform_kernel(x_ref, o_ref):
    # Upcast to f32 in-kernel, compute, write back in the native dtype.
    xf = x_ref[...].astype(jnp.float32)
    o_ref[...] = jnp.clip(xf * _CONTRAST + _BRIGHTNESS, 0.0, 1.0).astype(o_ref.dtype)


def _round_up(a, b):
    return ((a + b - 1) // b) * b


def _sublane_packing(dtype):
    # Packed sublane multiple: 8 for 4-byte, 16 for 2-byte, 32 for 1-byte dtypes.
    return {1: 32, 2: 16, 4: 8}.get(jnp.dtype(dtype).itemsize, 8)


def _apply_transform(x):
    """f(x): elementwise contrast/brightness + clamp, via a tiled Pallas kernel."""
    orig_shape = x.shape
    dtype = x.dtype
    if not jnp.issubdtype(dtype, jnp.floating):
        raise TypeError(
            f"prob_transform expects a floating dtype (got {dtype}); integer "
            "images would be truncated by the clamp to [0, 1].")

    n = x.size
    itemsize = jnp.dtype(dtype).itemsize
    packed = _sublane_packing(dtype)

    # Pick a lane width that divides n exactly so no wrapper-side pad (and thus
    # no extra HBM pass) is needed.  Fallback pads only the ragged tail.
    lanes = None
    for cand in _LANE_CHOICES:
        if n % cand == 0:
            lanes = cand
            break

    xf = jnp.ravel(x)
    padded_tail = 0
    if lanes is None:
        # TODO(synk): rare ragged case (n not a multiple of 128) still pays one
        # pad + one slice pass over the tensor.
        lanes = 128
        rows = pl.cdiv(n, lanes)
        padded_tail = rows * lanes - n
        xf = jnp.pad(xf, (0, padded_tail))
    else:
        rows = n // lanes
    x2 = xf.reshape(rows, lanes)

    # Tile rows: ~4 MiB blocks, rounded to the dtype's packed sublane multiple.
    max_tile = max(packed,
                   (_TARGET_BLOCK_BYTES // (lanes * itemsize)) // packed * packed)
    if rows <= packed:
        # Tiny input: a single full-extent block (allowed even if rows % 8 != 0).
        tile_r = rows
    elif rows <= max_tile:
        # Split into >= 2 grid steps so both v7x TensorCores get work.
        tile_r = max(packed, _round_up(pl.cdiv(rows, 2), packed))
    else:
        tile_r = max_tile
    grid = (pl.cdiv(rows, tile_r),)  # last block may overhang: boundary-masked

    cost = pl.CostEstimate(flops=2 * n, transcendentals=0,
                           bytes_accessed=2 * n * itemsize)

    out2 = pl.pallas_call(
        _transform_kernel,
        out_shape=jax.ShapeDtypeStruct((rows, lanes), dtype),
        grid_spec=pltpu.PrefetchScalarGridSpec(
            num_scalar_prefetch=0,
            grid=grid,
            in_specs=[pl.BlockSpec((tile_r, lanes), lambda i: (i, 0))],
            out_specs=pl.BlockSpec((tile_r, lanes), lambda i: (i, 0)),
        ),
        compiler_params=pltpu.CompilerParams(
            dimension_semantics=("parallel",),
            vmem_limit_bytes=_VMEM_LIMIT_BYTES),
        cost_estimate=cost,
    )(x2)

    out = out2.reshape(-1)
    if padded_tail:
        out = out[:n]
    return out.reshape(orig_shape)


def prob_transform(x, key=None, p=1.0):
    """Pallas implementation of ProbTransform.forward.

    `p` is a Python float (module attribute), so the p>=1 (default) and p<=0
    cases short-circuit at trace time: no RNG launch, no lax.cond.  For
    0 < p < 1 the draw `random.random() < p` is reproduced with the JAX PRNG.
    """
    if p >= 1.0:
        return _apply_transform(x)
    if p <= 0.0:
        return x

    if key is None:
        raise ValueError("a PRNG key is required for 0 < p < 1")
    u = jax.random.uniform(key, ())
    # TODO(synk): the identity branch of lax.cond still materializes one HBM
    # copy of x unless the caller arranges buffer donation / aliasing at the
    # jit boundary; results are correct either way.
    return lax.cond(u < p, _apply_transform, lambda v: v, x)


if __name__ == "__main__":
    key = jax.random.PRNGKey(0)
    k_data, k_draw = jax.random.split(key)

    # Small NCHW image batch, values in [0, 1) like normalized images.
    x = jax.random.uniform(k_data, (2, 4, 16, 16), dtype=jnp.float32)
    ref = jnp.clip(x * _CONTRAST + _BRIGHTNESS, 0.0, 1.0)

    # p = 1.0 (module default): f always applied, static short-circuit.
    y = jax.block_until_ready(prob_transform(x, k_draw, p=1.0))
    assert y.shape == x.shape and y.dtype == x.dtype
    assert jnp.max(jnp.abs(y - ref)) < 1e-6

    # p = 0.0: identity, static short-circuit (bit-exact).
    y_id = jax.block_until_ready(prob_transform(x, k_draw, p=0.0))
    assert jnp.max(jnp.abs(y_id - x)) == 0.0

    # 0 < p < 1: exercises the lax.cond path; result is either f(x) or x.
    y_p = jax.block_until_ready(prob_transform(x, k_draw, p=0.5))
    assert (jnp.max(jnp.abs(y_p - ref)) < 1e-6) or (jnp.max(jnp.abs(y_p - x)) == 0.0)

    # Medium tensor: exercises a multi-step grid (rows=192 -> 2 blocks, no pad).
    x2 = jax.random.uniform(k_data, (8, 3, 64, 64), dtype=jnp.float32)
    y2 = jax.block_until_ready(prob_transform(x2, p=1.0))
    assert jnp.max(jnp.abs(y2 - jnp.clip(x2 * _CONTRAST + _BRIGHTNESS, 0.0, 1.0))) < 1e-6

    # Shape whose row count (12) is not a tile multiple: overhanging last
    # block, handled by Pallas boundary masking with no wrapper pad/slice.
    x3 = jax.random.uniform(k_data, (3, 4, 16, 32), dtype=jnp.float32)
    y3 = jax.block_until_ready(prob_transform(x3, p=1.0))
    assert jnp.max(jnp.abs(y3 - jnp.clip(x3 * _CONTRAST + _BRIGHTNESS, 0.0, 1.0))) < 1e-6

    print("KERNEL_OK")
</pallas_src>

<mosaic_0001>
module attributes {stable_mosaic.version = 11 : i64} {
  func.func @_transform_kernel(%arg0: i32, %arg1: memref<4x512xf32, #tpu.memory_space<vmem>>, %arg2: memref<4x512xf32, #tpu.memory_space<vmem>>) attributes {dimension_semantics = [#tpu.dimension_semantics<parallel>], iteration_bounds = array<i64: 1>, scalar_prefetch = 0 : i64, scratch_operands = 0 : i64, tpu.core_type = #tpu.core_type<tc>, window_params = [{transform_indices = @transform_0, window_bounds = array<i64: 4, 512>}, {transform_indices = @transform_1, window_bounds = array<i64: 4, 512>}]} {
    %c0 = arith.constant 0 : index
    %c0_0 = arith.constant 0 : index
    %0 = vector.load %arg1[%c0, %c0_0] : memref<4x512xf32, #tpu.memory_space<vmem>>, vector<4x512xf32>
    %cst = arith.constant 1.200000e+00 : f32
    %1 = vector.broadcast %cst : f32 to vector<4x512xf32>
    %2 = arith.mulf %0, %1 : vector<4x512xf32>
    %cst_1 = arith.constant 1.000000e-01 : f32
    %3 = vector.broadcast %cst_1 : f32 to vector<4x512xf32>
    %4 = arith.addf %2, %3 : vector<4x512xf32>
    %cst_2 = arith.constant 0.000000e+00 : f32
    %cst_3 = arith.constant 1.000000e+00 : f32
    %5 = vector.broadcast %cst_2 : f32 to vector<4x512xf32>
    %6 = arith.maximumf %5, %4 : vector<4x512xf32>
    %7 = vector.broadcast %cst_3 : f32 to vector<4x512xf32>
    %8 = arith.minimumf %7, %6 : vector<4x512xf32>
    %c0_4 = arith.constant 0 : index
    %c0_5 = arith.constant 0 : index
    %9 = vector.load %arg2[%c0_4, %c0_5] : memref<4x512xf32, #tpu.memory_space<vmem>>, vector<4x512xf32>
    tpu.vector_store %arg2[%c0_4, %c0_5], %8 {strides = array<i32>} : memref<4x512xf32, #tpu.memory_space<vmem>>, vector<4x512xf32>,
    return
  }
  func.func @transform_0(%arg0: i32) -> (i32, i32) {
    %c0_i32 = arith.constant 0 : i32
    %c0_i32_0 = arith.constant 0 : i32
    return %arg0, %c0_i32 : i32, i32
  }
  func.func @transform_1(%arg0: i32) -> (i32, i32) {
    %c0_i32 = arith.constant 0 : i32
    %c0_i32_0 = arith.constant 0 : i32
    return %arg0, %c0_i32 : i32, i32
  }
}

</mosaic_0001>

<bundles_post_ra>
// kernel: tpu_custom_call.1
= control target key start
LH: loop header
LB: loop body
LE: loop exit
PB: predicated region body
PF: predicated region fallthrough
CT: control target
= control target key end

     0   :  { %6 = vsyncpa [#allocation3], 0  ;;  %s112_s0 = inlined_call_operand.hbm [shape: f32[4,512], index: 0, kind: input, shape index: {}]   ;;  %s113_s1 = inlined_call_operand.hbm [shape: f32[4,512], index: 1, kind: output, shape index: {}]  }
   0x1   :  { %7 = vsyncpa [#allocation4], 0  ;;  %s94_s6 = smov [#allocation2]  }
   0x2   :  { %s14_s7 = sshll.u32 %s94_s6, 4  ;;  %s15_s7 = int_to_ptr.vmem [resolvable:$true] %s14_s7 }
   0x3   :  { %s58_s8 = scalar_lea.vmem %s15_s7, 256  ;;  %p63_p1 = scmp.lt.s32.totalorder %s15_s7, %s15_s7 }
   0x4   :  { %p59_p0 = scmp.ne.s32.totalorder %s15_s7, %s58_s8  ;;  %p64_p2 = scmp.lt.s32.totalorder %s58_s8, %s58_s8 }
   0x6   :  { %p65_p3 = por %p64_p2, %p63_p1 }
   0x8   :  { %p66_p4 = pnand %p65_p3, %p59_p0 }
   0xa   :  { %69 = shalt.err (!%p66_p4)
}
   0xb   :  { %17 = dma.hbm_to_vmem [thread:$0]  %s112_s0, 256, %s15_s7, [#allocation3]  }
   0xc   :  { %90 = dma.done.wait [#allocation3], 256  }
   0xd   :  { %91 = vsyncadd [#allocation3], 4294967040  ;;  %v21_v0 = vld [vmem:[#allocation2] sm:$0xff]  ;;  %v22_v1 = vld [vmem:[#allocation2 + $0x8] sm:$0xff]  ;;  %s95_s11 = smov [#allocation5]  }
   0xe   :  { %v23_v2 = vmul.f32 1.2, %v21_v0  ;;  %v24_v3 = vmul.f32 1.2, %v22_v1  ;;  %s39_s12 = sshll.u32 %s95_s11, 4  ;;  %s40_s12 = int_to_ptr.vmem [resolvable:$true] %s39_s12 }
   0xf   :  { %s70_s13 = scalar_lea.vmem %s40_s12, 256  ;;  %p75_p6 = scmp.lt.s32.totalorder %s40_s12, %s40_s12 }
  0x10   :  { %v25_v4 = vadd.f32 0.1, %v23_v2  ;;  %v26_v5 = vadd.f32 0.1, %v24_v3  ;;  %p71_p5 = scmp.ne.s32.totalorder %s40_s12, %s70_s13  ;;  %p76_p7 = scmp.lt.s32.totalorder %s70_s13, %s70_s13 }
  0x12   :  { %v27_v6 = vmax.f32 %v25_v4, 0.0  ;;  %v28_v7 = vmax.f32 %v26_v5, 0.0  ;;  %p77_p8 = por %p76_p7, %p75_p6 }
  0x14   :  { %v29_v8 = vmin.f32 %v27_v6, 1.0  ;;  %v30_v9 = vmin.f32 %v28_v7, 1.0  ;;  %p78_p9 = pnand %p77_p8, %p71_p5 }
  0x16   :  { %31 = vst [vmem:[#allocation5] sm:$0xff] %v29_v8  ;;  %32 = vst [vmem:[#allocation5 + $0x8] sm:$0xff] %v30_v9 }
  0x17   :  { %81 = shalt.err (!%p78_p9)
}
  0x18   :  { %42 = dma.vmem_to_hbm [thread:$0]  %s40_s12, 256, %s113_s1, [#allocation4]  }
  0x19   :  { %92 = dma.done.wait [#allocation4], 256  }
  0x1a   :  { %93 = vsyncadd [#allocation4], 4294967040 }
  0x1b   :  { %46 = vsyncpa [#allocation3], 1 }
  0x1c   :  { %47 = vsyncpa [#allocation4], 1 }

</bundles_post_ra>
